<compile_context>
chip_gen: v5e
topology: v5e:2x2
jax: 0.10.0
libtpu: 0.0.40
codegen_flags: <defaults>
</compile_context>

<pallas_src>
import functools

import jax
import jax.numpy as jnp
from jax.experimental import pallas as pl
from jax.experimental.pallas import tpu as pltpu

IN_FEAT = 5
HIDDEN = 64


# --------------------------------------------------------------------------- Pallas kernel
def _age_gcn_fused_kernel(x_ref, a_ref, pool_ref,
                          w1_ref, b1_ref, w2_ref, b2_ref,
                          linw_ref, linb_ref, out_ref, *, compute_dtype):
    """Whole AgeGCN forward on fully VMEM-resident operands (single grid step)."""
    cd = compute_dtype
    a = a_ref[...].astype(cd)                                       # (N, N)

    # ---- layer 1: relu( Â (X W1) + b1 ) ------------------------------------
    xw = jnp.dot(x_ref[...].astype(cd), w1_ref[...].astype(cd),
                 preferred_element_type=jnp.float32)                # (N, H)
    h = jnp.dot(a, xw.astype(cd), preferred_element_type=jnp.float32) + b1_ref[...]
    h = jnp.maximum(h, 0.0)

    # ---- layer 2: relu( Â (H W2) + b2 ) ------------------------------------
    hw = jnp.dot(h.astype(cd), w2_ref[...].astype(cd),
                 preferred_element_type=jnp.float32)                # (N, H)
    h2 = jnp.dot(a, hw.astype(cd), preferred_element_type=jnp.float32) + b2_ref[...]
    h2 = jnp.maximum(h2, 0.0)

    # ---- global mean pool ----------------------------------------------------
    g = jnp.dot(pool_ref[...].astype(cd), h2.astype(cd),
                preferred_element_type=jnp.float32)                 # (G, H)

    # ---- linear head as a VPU/XLU reduction (no 1-column MXU matmul) --------
    out_ref[...] = jnp.sum(g * linw_ref[...], axis=-1, keepdims=True) + linb_ref[...]


def _cost_estimate(n, f_in, h, g):
    flops = 2 * (n * f_in * h + n * n * h + n * h * h + n * n * h + g * n * h + g * h)
    bytes_accessed = 4 * (n * f_in + n * n + g * n + f_in * h + h + h * h + h + h + 1 + g)
    return pl.CostEstimate(flops=flops, transcendentals=0, bytes_accessed=bytes_accessed)


# --------------------------------------------------------------------------- JAX glue
def normalized_adjacency(edge_index, num_nodes):
    """Dense D^-1/2 (A + I) D^-1/2 matching PyG gcn_norm (messages flow src -> dst)."""
    src, dst = edge_index[0], edge_index[1]
    a = jnp.zeros((num_nodes, num_nodes), jnp.float32)
    a = a.at[dst, src].add(1.0)                       # A[i, j] = #edges j -> i
    a = a + jnp.eye(num_nodes, dtype=jnp.float32)     # add self loops
    deg = a.sum(axis=1)                               # deg = in-degree + 1
    dinv = jax.lax.rsqrt(deg)
    return a * dinv[:, None] * dinv[None, :]


def mean_pool_matrix(batch, num_graphs, num_nodes):
    """(num_graphs, num_nodes) matrix P such that P @ H == global_mean_pool(H, batch)."""
    onehot = (batch[None, :] == jnp.arange(num_graphs)[:, None]).astype(jnp.float32)
    counts = jnp.maximum(onehot.sum(axis=1, keepdims=True), 1.0)
    return onehot / counts


def age_gcn_forward(params, x, edge_index, batch, num_graphs,
                    compute_dtype=jnp.float32):
    n = x.shape[0]
    a_norm = normalized_adjacency(edge_index, n)
    pool = mean_pool_matrix(batch, num_graphs, n)

    xf = x.astype(jnp.float32)
    w1 = params["w1"].astype(jnp.float32)
    b1 = params["b1"].astype(jnp.float32).reshape(1, HIDDEN)
    w2 = params["w2"].astype(jnp.float32)
    b2 = params["b2"].astype(jnp.float32).reshape(1, HIDDEN)
    lin_w = params["lin_w"].astype(jnp.float32).reshape(1, HIDDEN)   # == lin_w.T row
    lin_b = params["lin_b"].astype(jnp.float32).reshape(1, 1)

    vmem = pl.BlockSpec(memory_space=pltpu.MemorySpace.VMEM)
    out = pl.pallas_call(
        functools.partial(_age_gcn_fused_kernel, compute_dtype=compute_dtype),
        out_shape=jax.ShapeDtypeStruct((num_graphs, 1), jnp.float32),
        in_specs=[vmem] * 9,
        out_specs=vmem,
        cost_estimate=_cost_estimate(n, IN_FEAT, HIDDEN, num_graphs),
    )(xf, a_norm, pool, w1, b1, w2, b2, lin_w, lin_b)

    return jnp.squeeze(out, axis=-1)                                  # (G,)


def reference_forward(params, x, edge_index, batch, num_graphs):
    """Plain-JAX reference of the same forward (for correctness check)."""
    n = x.shape[0]
    a = normalized_adjacency(edge_index, n)
    pool = mean_pool_matrix(batch, num_graphs, n)
    h = jnp.maximum(a @ (x @ params["w1"]) + params["b1"], 0.0)
    h = jnp.maximum(a @ (h @ params["w2"]) + params["b2"], 0.0)
    g = pool @ h
    return jnp.squeeze(g @ params["lin_w"] + params["lin_b"], axis=-1)


def init_params(key):
    k1, k2, k3 = jax.random.split(key, 3)

    def w(k, shape):
        return (jax.random.normal(k, shape, jnp.float32) / jnp.sqrt(shape[0])).astype(jnp.float32)

    return {
        "w1": w(k1, (IN_FEAT, HIDDEN)), "b1": jnp.zeros((HIDDEN,), jnp.float32),
        "w2": w(k2, (HIDDEN, HIDDEN)), "b2": jnp.zeros((HIDDEN,), jnp.float32),
        "lin_w": w(k3, (HIDDEN, 1)), "lin_b": jnp.zeros((1,), jnp.float32),
    }


# --------------------------------------------------------------------------- demo
if __name__ == "__main__":
    key = jax.random.PRNGKey(0)
    pkey, xkey = jax.random.split(key)

    NUM_GRAPHS = 2
    NODES_PER_GRAPH = 16
    N = NUM_GRAPHS * NODES_PER_GRAPH

    params = init_params(pkey)
    x = jax.random.normal(xkey, (N, IN_FEAT), jnp.float32)

    # Deterministic edges: an undirected ring inside each graph (both directions listed).
    src, dst = [], []
    for g in range(NUM_GRAPHS):
        off = g * NODES_PER_GRAPH
        for i in range(NODES_PER_GRAPH):
            j = (i + 1) % NODES_PER_GRAPH
            src += [off + i, off + j]
            dst += [off + j, off + i]
    edge_index = jnp.array([src, dst], dtype=jnp.int32)               # (2, 64)
    batch = jnp.repeat(jnp.arange(NUM_GRAPHS, dtype=jnp.int32), NODES_PER_GRAPH)

    fwd = jax.jit(age_gcn_forward, static_argnums=4)
    out = fwd(params, x, edge_index, batch, NUM_GRAPHS)
    jax.block_until_ready(out)

    ref = reference_forward(params, x, edge_index, batch, NUM_GRAPHS)
    jax.block_until_ready(ref)

    assert out.shape == (NUM_GRAPHS,), out.shape
    assert bool(jnp.all(jnp.isfinite(out)))
    assert bool(jnp.allclose(out, ref, rtol=1e-4, atol=1e-4)), (out, ref)
    print("KERNEL_OK")
</pallas_src>

<mosaic_0001>
module attributes {stable_mosaic.version = 11 : i64} {
  func.func @_age_gcn_fused_kernel(%arg0: memref<32x5xf32, #tpu.memory_space<vmem>>, %arg1: memref<32x32xf32, #tpu.memory_space<vmem>>, %arg2: memref<2x32xf32, #tpu.memory_space<vmem>>, %arg3: memref<5x64xf32, #tpu.memory_space<vmem>>, %arg4: memref<1x64xf32, #tpu.memory_space<vmem>>, %arg5: memref<64x64xf32, #tpu.memory_space<vmem>>, %arg6: memref<1x64xf32, #tpu.memory_space<vmem>>, %arg7: memref<1x64xf32, #tpu.memory_space<vmem>>, %arg8: memref<1x1xf32, #tpu.memory_space<vmem>>, %arg9: memref<2x1xf32, #tpu.memory_space<vmem>>) attributes {dimension_semantics = [], scalar_prefetch = 0 : i64, scratch_operands = 0 : i64, tpu.core_type = #tpu.core_type<tc>} {
    %c0 = arith.constant 0 : index
    %c0_0 = arith.constant 0 : index
    %0 = vector.load %arg1[%c0, %c0_0] : memref<32x32xf32, #tpu.memory_space<vmem>>, vector<32x32xf32>
    %c0_1 = arith.constant 0 : index
    %c0_2 = arith.constant 0 : index
    %1 = vector.load %arg0[%c0_1, %c0_2] : memref<32x5xf32, #tpu.memory_space<vmem>>, vector<32x5xf32>
    %c0_3 = arith.constant 0 : index
    %c0_4 = arith.constant 0 : index
    %2 = vector.load %arg3[%c0_3, %c0_4] : memref<5x64xf32, #tpu.memory_space<vmem>>, vector<5x64xf32>
    %cst = arith.constant dense<0.000000e+00> : vector<32x64xf32>
    %3 = tpu.matmul %1, %2, %cst {dimension_numbers = #tpu.dot_dimension_numbers<[1], [0], [0], [1], [0, 0, 1, 1], [], []>} : vector<32x5xf32>, vector<5x64xf32>, vector<32x64xf32> -> vector<32x64xf32>
    %cst_5 = arith.constant dense<0.000000e+00> : vector<32x64xf32>
    %4 = tpu.matmul %0, %3, %cst_5 {dimension_numbers = #tpu.dot_dimension_numbers<[1], [0], [0], [1], [0, 0, 1, 1], [], []>} : vector<32x32xf32>, vector<32x64xf32>, vector<32x64xf32> -> vector<32x64xf32>
    %c0_6 = arith.constant 0 : index
    %c0_7 = arith.constant 0 : index
    %5 = vector.load %arg4[%c0_6, %c0_7] : memref<1x64xf32, #tpu.memory_space<vmem>>, vector<1x64xf32>
    %6 = vector.broadcast %5 : vector<1x64xf32> to vector<32x64xf32>
    %7 = arith.addf %4, %6 : vector<32x64xf32>
    %cst_8 = arith.constant 0.000000e+00 : f32
    %8 = vector.broadcast %cst_8 : f32 to vector<32x64xf32>
    %9 = arith.maximumf %7, %8 : vector<32x64xf32>
    %c0_9 = arith.constant 0 : index
    %c0_10 = arith.constant 0 : index
    %10 = vector.load %arg5[%c0_9, %c0_10] : memref<64x64xf32, #tpu.memory_space<vmem>>, vector<64x64xf32>
    %cst_11 = arith.constant dense<0.000000e+00> : vector<32x64xf32>
    %11 = tpu.matmul %9, %10, %cst_11 {dimension_numbers = #tpu.dot_dimension_numbers<[1], [0], [0], [1], [0, 0, 1, 1], [], []>} : vector<32x64xf32>, vector<64x64xf32>, vector<32x64xf32> -> vector<32x64xf32>
    %cst_12 = arith.constant dense<0.000000e+00> : vector<32x64xf32>
    %12 = tpu.matmul %0, %11, %cst_12 {dimension_numbers = #tpu.dot_dimension_numbers<[1], [0], [0], [1], [0, 0, 1, 1], [], []>} : vector<32x32xf32>, vector<32x64xf32>, vector<32x64xf32> -> vector<32x64xf32>
    %c0_13 = arith.constant 0 : index
    %c0_14 = arith.constant 0 : index
    %13 = vector.load %arg6[%c0_13, %c0_14] : memref<1x64xf32, #tpu.memory_space<vmem>>, vector<1x64xf32>
    %14 = vector.broadcast %13 : vector<1x64xf32> to vector<32x64xf32>
    %15 = arith.addf %12, %14 : vector<32x64xf32>
    %cst_15 = arith.constant 0.000000e+00 : f32
    %16 = vector.broadcast %cst_15 : f32 to vector<32x64xf32>
    %17 = arith.maximumf %15, %16 : vector<32x64xf32>
    %c0_16 = arith.constant 0 : index
    %c0_17 = arith.constant 0 : index
    %18 = vector.load %arg2[%c0_16, %c0_17] : memref<2x32xf32, #tpu.memory_space<vmem>>, vector<2x32xf32>
    %cst_18 = arith.constant dense<0.000000e+00> : vector<2x64xf32>
    %19 = tpu.matmul %18, %17, %cst_18 {dimension_numbers = #tpu.dot_dimension_numbers<[1], [0], [0], [1], [0, 0, 1, 1], [], []>} : vector<2x32xf32>, vector<32x64xf32>, vector<2x64xf32> -> vector<2x64xf32>
    %c0_19 = arith.constant 0 : index
    %c0_20 = arith.constant 0 : index
    %20 = vector.load %arg7[%c0_19, %c0_20] : memref<1x64xf32, #tpu.memory_space<vmem>>, vector<1x64xf32>
    %21 = vector.broadcast %20 : vector<1x64xf32> to vector<2x64xf32>
    %22 = arith.mulf %19, %21 : vector<2x64xf32>
    %cst_21 = arith.constant dense<0.000000e+00> : vector<2xf32>
    %23 = vector.multi_reduction <add>, %22, %cst_21 [1] : vector<2x64xf32> to vector<2xf32>
    %24 = vector.shape_cast %23 : vector<2xf32> to vector<2x1xf32>
    %c0_22 = arith.constant 0 : index
    %c0_23 = arith.constant 0 : index
    %25 = vector.load %arg8[%c0_22, %c0_23] : memref<1x1xf32, #tpu.memory_space<vmem>>, vector<1x1xf32>
    %26 = vector.broadcast %25 : vector<1x1xf32> to vector<2x1xf32>
    %27 = arith.addf %24, %26 : vector<2x1xf32>
    %c0_24 = arith.constant 0 : index
    %c0_25 = arith.constant 0 : index
    %28 = vector.load %arg9[%c0_24, %c0_25] : memref<2x1xf32, #tpu.memory_space<vmem>>, vector<2x1xf32>
    tpu.vector_store %arg9[%c0_24, %c0_25], %27 {strides = array<i32>} : memref<2x1xf32, #tpu.memory_space<vmem>>, vector<2x1xf32>,
    return
  }
}

</mosaic_0001>

<bundles_post_ra>
// kernel: age_gcn_forward.1
= control target key start
LH: loop header
LB: loop body
LE: loop exit
PB: predicated region body
PF: predicated region fallthrough
CT: control target
= control target key end

     0   :  { %vm56_vm0 = vcmask 1044480   ;;  %vm43_vm1 = vcmask 39936   ;;  %vm93_vm2 = vcmask 261120   ;;  %vm147_vm3 = vcmask 523264   ;;  %s420_s3 = inlined_call_operand.vmem [shape: f32[5,64], index: 3, kind: input, shape index: {}]   ;;  %s421_s0 = inlined_call_operand.vmem [shape: f32[32,5], index: 0, kind: input, shape index: {}]   ;;  %s422_s4 = inlined_call_operand.vmem [shape: f32[1,64], index: 4, kind: input, shape index: {}]   ;;  %s423_s5 = inlined_call_operand.vmem [shape: f32[64,64], index: 5, kind: input, shape index: {}]   ;;  %s424_s1 = inlined_call_operand.vmem [shape: f32[32,32], index: 1, kind: input, shape index: {}]   ;;  %s425_s6 = inlined_call_operand.vmem [shape: f32[1,64], index: 6, kind: input, shape index: {}]   ;;  %s426_s7 = inlined_call_operand.vmem [shape: f32[1,64], index: 7, kind: input, shape index: {}]   ;;  %s427_s2 = inlined_call_operand.vmem [shape: f32[2,32], index: 2, kind: input, shape index: {}]   ;;  %s428_s8 = inlined_call_operand.<no memory space> [shape: f32[1,1], index: 8, kind: input, shape index: {}]   ;;  %s429_s9 = inlined_call_operand.vmem [shape: f32[2,1], index: 9, kind: output, shape index: {}]  }
   0x1   :  { %v42_v0 = vld [vmem:[%s420_s3] sm:$0x1f]  ;;  %v39_v2 = vld [vmem:[%s421_s0 + $0x8] sm:$0xff]  ;;  %v40_v3 = vld [vmem:[%s421_s0 + $0x10] sm:$0xff]  ;;  %v14_v52 = vstv %s428_s8  ;;  %vm255_vm4 = vcmask 517120   ;;  %vm264_vm5 = vcmask 1024  }
   0x2   :  { %v38_v1 = vld [vmem:[%s421_s0] sm:$0xff]  ;;  %270 = vmatpush.msk.msra.mxu0 %vm56_vm0, %v42_v0  ;;  %v41_v4 = vld [vmem:[%s421_s0 + $0x18] sm:$0xff]  ;;  %v145_v10 = vld [vmem:[%s423_s5 + $0x30] sm:$0xff]  ;;  %15 = vst [vmem:[#allocation2] sm:$0x1] %v14_v52 }
   0x3   :  { %271 = vmatmul.msk.f32.vlgmr.msra.gmra.mxu0 %vm43_vm1, %v38_v1  ;;  %v146_v9 = vld [vmem:[%s423_s5 + $0x38] sm:$0xff]  ;;  %v144_v11 = vld [vmem:[%s423_s5 + $0x28] sm:$0xff]  ;;  %v143_v12 = vld [vmem:[%s423_s5 + $0x20] sm:$0xff] }
   0x4   :  { %168 = vmatpush.msra.mxu2 %v146_v9  ;;  %v34_v13 = vld [vmem:[%s424_s1] sm:$0xff]  ;;  %v142_v14 = vld [vmem:[%s423_s5 + $0x18] sm:$0xff]  ;;  %v35_v15 = vld [vmem:[%s424_s1 + $0x8] sm:$0xff] }
   0x5   :  { %v36_v16 = vld [vmem:[%s424_s1 + $0x10] sm:$0xff]  ;;  %v37_v17 = vld [vmem:[%s424_s1 + $0x18] sm:$0xff]  ;;  %v140_v19 = vld [vmem:[%s423_s5 + $0x8] sm:$0xff] }
   0x6   :  { %169 = vmatpush.msra.mxu2 %v145_v10  ;;  %v141_v18 = vld [vmem:[%s423_s5 + $0x10] sm:$0xff]  ;;  %v139_v20 = vld [vmem:[%s423_s5] sm:$0xff] }
   0x7   :  { %v288_v21 = vld [vmem:[%s422_s4] ss:$0 sm:$0xff] }
   0x8   :  { %170 = vmatpush.msra.mxu2 %v144_v11  ;;  %v289_v41 = vld [vmem:[%s425_s6] ss:$0 sm:$0xff] }
   0x9   :  { %v226_v51 = vld [vmem:[%s427_s2] sm:$0x3] }
   0xa   :  { %171 = vmatpush.msra.mxu2 %v143_v12  ;;  %v290_v53 = vld [vmem:[%s426_s7] ss:$0 sm:$0xff] }
   0xb   :  { %272 = vmatmul.msk.f32.gmra.mxu0 %vm43_vm1, %v39_v2  ;;  %v291_v57 = vld [vmem:[#allocation2] ss:$0 sm:$0xff] }
   0xc   :  { %172 = vmatpush.msra.mxu2 %v142_v14 }
   0xe   :  { %173 = vmatpush.msra.mxu2 %v141_v18 }
  0x10   :  { %174 = vmatpush.msra.mxu2 %v140_v19 }
  0x12   :  { %175 = vmatpush.msra.mxu2 %v139_v20 }
  0x13   :  { %273 = vmatmul.msk.f32.gmra.mxu0 %vm43_vm1, %v40_v3 }
  0x1b   :  { %274 = vmatmul.msk.f32.gmra.mxu0 %vm43_vm1, %v41_v4 }
  0x80   :  { %v77_v5 = vpop.f32.mrf.mxu0 }
  0x88   :  { %v80_v6 = vpop.f32.mrf.mxu0 }
  0x90   :  { %v83_v7 = vpop.f32.mrf.mxu0 }
  0x98   :  { %v86_v8 = vpop.f32.mrf.mxu0 }
  0x99   :  { %118 = vmatpush.msra.mxu1 %v86_v8 }
  0x9b   :  { %119 = vmatpush.msra.mxu1 %v83_v7 }
  0x9d   :  { %120 = vmatpush.msra.mxu1 %v80_v6 }
  0x9f   :  { %121 = vmatpush.msra.mxu1 %v77_v5 }
  0xa0   :  { %275 = vmatmul.msk.f32.vlgmr.msra.gmra.mxu1 %vm93_vm2, %v34_v13 }
  0xa8   :  { %276 = vmatmul.msk.f32.gmra.mxu1 %vm93_vm2, %v35_v15 }
  0xb0   :  { %277 = vmatmul.msk.f32.gmra.mxu1 %vm93_vm2, %v36_v16 }
  0xb8   :  { %278 = vmatmul.msk.f32.gmra.mxu1 %vm93_vm2, %v37_v17 }
 0x11d   :  { %v123_v22 = vpop.f32.mrf.mxu1 }
 0x11e   :  { %v124_v23 = vadd.f32 %v288_v21, %v123_v22 }
 0x120   :  { %v135_v24 = vmax.f32 %v124_v23, 0.0 }
 0x122   :  { %279 = vmatmul.msk.f32.vlgmr.msra.gmra.mxu2 %vm147_vm3, %v135_v24 }
 0x125   :  { %v126_v25 = vpop.f32.mrf.mxu1 }
 0x126   :  { %v127_v26 = vadd.f32 %v288_v21, %v126_v25 }
 0x128   :  { %v136_v27 = vmax.f32 %v127_v26, 0.0 }
 0x12a   :  { %280 = vmatmul.msk.f32.gmra.mxu2 %vm147_vm3, %v136_v27 }
 0x12d   :  { %v129_v28 = vpop.f32.mrf.mxu1 }
 0x12e   :  { %v130_v29 = vadd.f32 %v288_v21, %v129_v28 }
 0x130   :  { %v137_v30 = vmax.f32 %v130_v29, 0.0 }
 0x132   :  { %281 = vmatmul.msk.f32.gmra.mxu2 %vm147_vm3, %v137_v30 }
 0x135   :  { %v132_v31 = vpop.f32.mrf.mxu1 }
 0x136   :  { %v133_v32 = vadd.f32 %v288_v21, %v132_v31 }
 0x138   :  { %v138_v33 = vmax.f32 %v133_v32, 0.0 }
 0x13a   :  { %282 = vmatmul.msk.f32.gmra.mxu2 %vm147_vm3, %v138_v33 }
 0x1a5   :  { %v177_v34 = vpop.f32.mrf.mxu2 }
 0x1ad   :  { %v180_v35 = vpop.f32.mrf.mxu2 }
 0x1b5   :  { %v183_v36 = vpop.f32.mrf.mxu2 }
 0x1bd   :  { %v186_v37 = vpop.f32.mrf.mxu2 }
 0x1be   :  { %205 = vmatpush.msra.mxu3 %v186_v37 }
 0x1c0   :  { %206 = vmatpush.msra.mxu3 %v183_v36 }
 0x1c2   :  { %207 = vmatpush.msra.mxu3 %v180_v35 }
 0x1c4   :  { %208 = vmatpush.msra.mxu3 %v177_v34 }
 0x1c5   :  { %283 = vmatmul.msk.f32.vlgmr.msra.gmra.mxu3 %vm93_vm2, %v34_v13 }
 0x1cd   :  { %284 = vmatmul.msk.f32.gmra.mxu3 %vm93_vm2, %v35_v15 }
 0x1d5   :  { %285 = vmatmul.msk.f32.gmra.mxu3 %vm93_vm2, %v36_v16 }
 0x1dd   :  { %286 = vmatmul.msk.f32.gmra.mxu3 %vm93_vm2, %v37_v17 }
 0x248   :  { %v210_v38 = vpop.f32.mrf.mxu3 }
 0x249   :  { %v211_v47 = vadd.f32 %v289_v41, %v210_v38 }
 0x24b   :  { %v222_v50 = vmax.f32 %v211_v47, 0.0 }
 0x250   :  { %v213_v39 = vpop.f32.mrf.mxu3 }
 0x251   :  { %v214_v45 = vadd.f32 %v289_v41, %v213_v39 }
 0x253   :  { %v223_v49 = vmax.f32 %v214_v45, 0.0 }
 0x258   :  { %v216_v40 = vpop.f32.mrf.mxu3 }
 0x259   :  { %v217_v43 = vadd.f32 %v289_v41, %v216_v40 }
 0x25b   :  { %v224_v48 = vmax.f32 %v217_v43, 0.0 }
 0x260   :  { %v219_v42 = vpop.f32.mrf.mxu3 }
 0x261   :  { %v220_v44 = vadd.f32 %v289_v41, %v219_v42 }
 0x263   :  { %v225_v46 = vmax.f32 %v220_v44, 0.0 }
 0x265   :  { %242 = vmatpush.msrb.mxu0 %v225_v46 }
 0x267   :  { %243 = vmatpush.msrb.mxu0 %v224_v48 }
 0x269   :  { %244 = vmatpush.msrb.mxu0 %v223_v49 }
 0x26b   :  { %245 = vmatpush.msrb.mxu0 %v222_v50 }
 0x26c   :  { %287 = vmatmul.msk.f32.vlgmr.msrb.gmra.mxu0 %vm93_vm2, %v226_v51 }
 0x2e9   :  { %v247_v54 = vpop.f32.mrf.mxu0 }
 0x2ea   :  { %v254_v55 = vmul.f32 %v290_v53, %v247_v54 }
 0x2ec   :  { %v256_v56 = vsel %vm255_vm4, %v254_v55, 0.0 }
 0x2ed   :  { %257 = vadd.xlane.f32.xlu0 %v256_v56 }
 0x360   :  { %v258_v58 = vpop.xlane.xlu0 %257 }
 0x361   :  { %v263_v59 = vadd.f32 %v291_v57, %v258_v58 }
 0x363   :  { %265 = vst.msk [vmem:[%s429_s9] sm:$0x3] %vm264_vm5, %v263_v59 }

</bundles_post_ra>
